<compile_context>
chip_gen: v6e
topology: v6e:2x2x1
jax: 0.10.0
libtpu: 0.0.40
codegen_flags: <defaults>
</compile_context>

<pallas_src>
import functools

import jax
import jax.numpy as jnp
from jax.experimental import pallas as pl
from jax.experimental.pallas import tpu as pltpu

# Stand-ins for config.T_min / config.T_max
T_MIN = 1e-3
T_MAX = 0.999


def _flow_loss_kernel(w_ref, t_ref, yb_ref, z1_ref, z0_ref, out_ref, *, C, HW):
    # w_ref  : SMEM (C, C)         1x1-conv weight (in_ch, out_ch), scalar reads
    # t_ref  : VMEM (Bt, 1)        per-sample time
    # yb_ref : VMEM (Bt, C)        class_emb[y] + bias (per sample, per channel)
    # z1_ref : VMEM (Bt, C*HW)     data latents  (lane axis = C*HW, lane-dense)
    # z0_ref : VMEM (Bt, C*HW)     noise latents
    # out_ref: VMEM (Bt, 128)      per-sample partial squared-norm (lane-dense)
    t = jnp.clip(t_ref[...].astype(jnp.float32), T_MIN, T_MAX)   # (Bt, 1)

    # Streams may be bf16; keep all elementwise math in f32 (v5e: no bf16 VPU).
    z1 = z1_ref[...].astype(jnp.float32)                          # (Bt, C*HW)
    z0 = z0_ref[...].astype(jnp.float32)
    yb = yb_ref[...].astype(jnp.float32)                          # (Bt, C)

    d = z1 - z0                                  # reused: lerp + residual
    zt = z0 + t * d                              # == t*z1 + (1-t)*z0

    # Synthetic velocity model: channel mix on the VPU (MXU skipped, C=4).
    #   vtheta_c = sum_k w[k, c] * zt_k + b[c] + class_emb[y][:, c]
    # Residual squared-norm accumulated over channels without materializing
    # vtheta.  Channel k lives at lanes [k*HW, (k+1)*HW) — static 128-aligned
    # slices, so this is pure lane addressing (no transpose / gather).
    sq = None
    for c in range(C):
        acc = w_ref[0, c] * zt[:, 0:HW]                           # (Bt, HW)
        for k in range(1, C):
            acc = acc + w_ref[k, c] * zt[:, k * HW:(k + 1) * HW]
        r = acc + yb[:, c:c + 1] - d[:, c * HW:(c + 1) * HW]      # v_c - d_c
        sq = r * r if sq is None else sq + r * r                  # (Bt, HW)

    # Fold HW lanes down to 128 (aligned lane-tile slices -> cheap) so the
    # per-step store is one lane-dense row block.
    folded = sq[:, 0:128]
    for i in range(1, HW // 128):
        folded = folded + sq[:, i * 128:(i + 1) * 128]

    out_ref[...] = folded.astype(out_ref.dtype)                   # (Bt, 128)


def _pick_b_tile(N, row_bytes):
    """Pick the batch tile.

    row_bytes = bytes of one sample in one streamed input (C*HW*itemsize).
    Targets ~1 MiB per streamed input block (HBM-roofline-friendly, VMEM-safe
    on v7x's 32 MiB scoped default even with the f32 upcast temporaries),
    b_tile % 8 == 0 (sublane-dense blocks, unmasked stores), grid_n >= 4 and
    even (v7x megacore: each TC gets >= 2 pipelined steps).  Tiny batches run
    as a single grid step: per-step overhead (~0.35 us) dwarfs KBs of work.
    """
    target = 1 << 20
    if N < 16 or N % 16 != 0 or N * row_bytes <= 4 * target:
        return N
    best = None
    for cand in range(8, N // 4 + 1, 8):             # grid_n >= 4
        if N % cand != 0 or (N // cand) % 2 != 0:     # even grid_n (2 TCs)
            continue
        if cand * row_bytes > 2 * target:             # block <= ~2 MiB / input
            continue
        if best is None or (abs(cand * row_bytes - target)
                            < abs(best * row_bytes - target)):
            best = cand
    return best if best is not None else N


def flow_loss(z1_nchw, y, z0_nchw, t, w, b, class_emb,
              b_tile=None, stream_dtype=jnp.bfloat16):
    """Pallas-backed equivalent of Flow.loss_fn (with a synthetic model)."""
    N, C, H, W = z1_nchw.shape
    HW = H * W
    CHW = C * HW
    assert HW % 128 == 0, "H*W must be a multiple of 128 for this kernel"

    # Free reshape (row-major contiguous, no HBM transpose): NCHW -> (N, C*HW).
    # Stream the two large inputs at reduced precision (bandwidth-bound).
    z1 = z1_nchw.reshape(N, CHW).astype(stream_dtype)
    z0 = z0_nchw.reshape(N, CHW).astype(stream_dtype)

    # Tiny per-sample operands (plain JAX glue: gather + add), kept in f32.
    yb = (class_emb[y] + b[None, :]).astype(jnp.float32)          # (N, C)
    t2 = t.astype(jnp.float32)[:, None]                           # (N, 1)

    stream_itemsize = jnp.dtype(stream_dtype).itemsize
    if b_tile is None:
        b_tile = _pick_b_tile(N, CHW * stream_itemsize)
    assert N % b_tile == 0
    grid_n = N // b_tile

    cost = pl.CostEstimate(
        flops=int(N * HW * C * (2 * C + 7)),
        transcendentals=0,
        bytes_accessed=int(2 * N * CHW * stream_itemsize      # z1 + z0 streams
                           + N * (C + 1) * 4                  # t + yb
                           + N * 128 * 4                      # output
                           + C * C * 4),                      # weights
    )

    kernel = functools.partial(_flow_loss_kernel, C=C, HW=HW)

    out = pl.pallas_call(
        kernel,
        out_shape=jax.ShapeDtypeStruct((N, 128), jnp.float32),
        grid=(grid_n,),
        in_specs=[
            pl.BlockSpec(memory_space=pltpu.MemorySpace.SMEM),     # w  (C, C)
            pl.BlockSpec((b_tile, 1), lambda g: (g, 0)),           # t
            pl.BlockSpec((b_tile, C), lambda g: (g, 0)),           # yb
            pl.BlockSpec((b_tile, CHW), lambda g: (g, 0)),         # z1
            pl.BlockSpec((b_tile, CHW), lambda g: (g, 0)),         # z0
        ],
        out_specs=pl.BlockSpec((b_tile, 128), lambda g: (g, 0)),
        compiler_params=pltpu.CompilerParams(
            dimension_semantics=("parallel",)),
        cost_estimate=cost,
    )(w.astype(jnp.float32), t2, yb, z1, z0)

    per_sample = out.sum(axis=-1)                 # tiny final reduce (N, 128)->(N,)
    return {"loss": jnp.mean(per_sample), "per_sample": per_sample}


def flow_loss_reference(z1, y, z0, t, w, b, class_emb):
    """Pure-JAX reference mirroring the PyTorch loss_fn (NCHW layout)."""
    tc = jnp.clip(t, T_MIN, T_MAX)
    tw = tc[:, None, None, None]                              # wide(t)
    zt = tw * z1 + (1.0 - tw) * z0
    v = (jnp.einsum("nchw,cd->ndhw", zt, w)
         + b[None, :, None, None]
         + class_emb[y][:, :, None, None])
    r = v - (z1 - z0)
    per_sample = jnp.sum(r * r, axis=(1, 2, 3))               # sqnorm_image
    return {"loss": jnp.mean(per_sample), "per_sample": per_sample}


if __name__ == "__main__":
    key = jax.random.PRNGKey(0)
    k1, k2, k3, k4, k5, k6, k7 = jax.random.split(key, 7)

    N, C, H, W = 2, 4, 16, 16
    num_classes = 10

    # Inputs that loss_fn receives / samples (deterministic via PRNGKey(0)).
    z1 = jax.random.normal(k1, (N, C, H, W), jnp.float32)      # data latents
    y = jax.random.randint(k2, (N,), 0, num_classes)           # class labels
    z0 = jax.random.normal(k3, (N, C, H, W), jnp.float32)      # noise (randn_like)
    t = jax.random.uniform(k4, (N,), jnp.float32)              # times (rand)

    # Deterministic synthetic model parameters.
    w = 0.1 * jax.random.normal(k5, (C, C), jnp.float32)       # 1x1 conv (in, out)
    b = 0.1 * jax.random.normal(k6, (C,), jnp.float32)         # bias
    class_emb = 0.1 * jax.random.normal(k7, (num_classes, C), jnp.float32)

    out = flow_loss(z1, y, z0, t, w, b, class_emb)
    jax.block_until_ready(out["loss"])

    # The kernel streams z1/z0 as bf16; compare against the reference evaluated
    # on the identical bf16-rounded latents (both paths then compute in f32).
    z1_q = z1.astype(jnp.bfloat16).astype(jnp.float32)
    z0_q = z0.astype(jnp.bfloat16).astype(jnp.float32)
    ref = flow_loss_reference(z1_q, y, z0_q, t, w, b, class_emb)
    assert jnp.allclose(out["per_sample"], ref["per_sample"], rtol=1e-4, atol=1e-4), \
        (out["per_sample"], ref["per_sample"])
    assert jnp.allclose(out["loss"], ref["loss"], rtol=1e-4, atol=1e-4)

    print("KERNEL_OK")
</pallas_src>

<mosaic_0001>
module attributes {stable_mosaic.version = 11 : i64} {
  func.func @_flow_loss_kernel(%arg0: i32, %arg1: memref<4x4xf32, #tpu.memory_space<smem>>, %arg2: memref<2x1xf32, #tpu.memory_space<vmem>>, %arg3: memref<2x4xf32, #tpu.memory_space<vmem>>, %arg4: memref<2x1024xbf16, #tpu.memory_space<vmem>>, %arg5: memref<2x1024xbf16, #tpu.memory_space<vmem>>, %arg6: memref<2x128xf32, #tpu.memory_space<vmem>>) attributes {dimension_semantics = [#tpu.dimension_semantics<parallel>], iteration_bounds = array<i64: 1>, scalar_prefetch = 0 : i64, scratch_operands = 0 : i64, tpu.core_type = #tpu.core_type<tc>, window_params = [{transform_indices = @transform_0, window_bounds = array<i64: 4, 4>}, {transform_indices = @transform_1, window_bounds = array<i64: 2, 1>}, {transform_indices = @transform_2, window_bounds = array<i64: 2, 4>}, {transform_indices = @transform_3, window_bounds = array<i64: 2, 1024>}, {transform_indices = @transform_4, window_bounds = array<i64: 2, 1024>}, {transform_indices = @transform_5, window_bounds = array<i64: 2, 128>}]} {
    %c0 = arith.constant 0 : index
    %c0_0 = arith.constant 0 : index
    %0 = vector.load %arg2[%c0, %c0_0] : memref<2x1xf32, #tpu.memory_space<vmem>>, vector<2x1xf32>
    %cst = arith.constant 1.000000e-03 : f32
    %cst_1 = arith.constant 9.990000e-01 : f32
    %1 = vector.broadcast %cst : f32 to vector<2x1xf32>
    %2 = arith.maximumf %1, %0 : vector<2x1xf32>
    %3 = vector.broadcast %cst_1 : f32 to vector<2x1xf32>
    %4 = arith.minimumf %3, %2 : vector<2x1xf32>
    %c0_2 = arith.constant 0 : index
    %c0_3 = arith.constant 0 : index
    %5 = vector.load %arg4[%c0_2, %c0_3] : memref<2x1024xbf16, #tpu.memory_space<vmem>>, vector<2x1024xbf16>
    %6 = arith.extf %5 : vector<2x1024xbf16> to vector<2x1024xf32>
    %c0_4 = arith.constant 0 : index
    %c0_5 = arith.constant 0 : index
    %7 = vector.load %arg5[%c0_4, %c0_5] : memref<2x1024xbf16, #tpu.memory_space<vmem>>, vector<2x1024xbf16>
    %8 = arith.extf %7 : vector<2x1024xbf16> to vector<2x1024xf32>
    %c0_6 = arith.constant 0 : index
    %c0_7 = arith.constant 0 : index
    %9 = vector.load %arg3[%c0_6, %c0_7] : memref<2x4xf32, #tpu.memory_space<vmem>>, vector<2x4xf32>
    %10 = arith.subf %6, %8 : vector<2x1024xf32>
    %11 = vector.broadcast %4 : vector<2x1xf32> to vector<2x1024xf32>
    %12 = arith.mulf %11, %10 : vector<2x1024xf32>
    %13 = arith.addf %8, %12 : vector<2x1024xf32>
    %c0_8 = arith.constant 0 : index
    %c0_9 = arith.constant 0 : index
    %14 = memref.load %arg1[%c0_8, %c0_9] : memref<4x4xf32, #tpu.memory_space<smem>>
    %15 = vector.extract_strided_slice %13 {offsets = [0, 0], sizes = [2, 256], strides = [1, 1]} : vector<2x1024xf32> to vector<2x256xf32>
    %16 = vector.broadcast %14 : f32 to vector<2x256xf32>
    %17 = arith.mulf %16, %15 : vector<2x256xf32>
    %c1 = arith.constant 1 : index
    %c0_10 = arith.constant 0 : index
    %18 = memref.load %arg1[%c1, %c0_10] : memref<4x4xf32, #tpu.memory_space<smem>>
    %19 = vector.extract_strided_slice %13 {offsets = [0, 256], sizes = [2, 256], strides = [1, 1]} : vector<2x1024xf32> to vector<2x256xf32>
    %20 = vector.broadcast %18 : f32 to vector<2x256xf32>
    %21 = arith.mulf %20, %19 : vector<2x256xf32>
    %22 = arith.addf %17, %21 : vector<2x256xf32>
    %c2 = arith.constant 2 : index
    %c0_11 = arith.constant 0 : index
    %23 = memref.load %arg1[%c2, %c0_11] : memref<4x4xf32, #tpu.memory_space<smem>>
    %24 = vector.extract_strided_slice %13 {offsets = [0, 512], sizes = [2, 256], strides = [1, 1]} : vector<2x1024xf32> to vector<2x256xf32>
    %25 = vector.broadcast %23 : f32 to vector<2x256xf32>
    %26 = arith.mulf %25, %24 : vector<2x256xf32>
    %27 = arith.addf %22, %26 : vector<2x256xf32>
    %c3 = arith.constant 3 : index
    %c0_12 = arith.constant 0 : index
    %28 = memref.load %arg1[%c3, %c0_12] : memref<4x4xf32, #tpu.memory_space<smem>>
    %29 = vector.extract_strided_slice %13 {offsets = [0, 768], sizes = [2, 256], strides = [1, 1]} : vector<2x1024xf32> to vector<2x256xf32>
    %30 = vector.broadcast %28 : f32 to vector<2x256xf32>
    %31 = arith.mulf %30, %29 : vector<2x256xf32>
    %32 = arith.addf %27, %31 : vector<2x256xf32>
    %33 = vector.extract_strided_slice %9 {offsets = [0, 0], sizes = [2, 1], strides = [1, 1]} : vector<2x4xf32> to vector<2x1xf32>
    %34 = vector.broadcast %33 : vector<2x1xf32> to vector<2x256xf32>
    %35 = arith.addf %32, %34 : vector<2x256xf32>
    %36 = vector.extract_strided_slice %10 {offsets = [0, 0], sizes = [2, 256], strides = [1, 1]} : vector<2x1024xf32> to vector<2x256xf32>
    %37 = arith.subf %35, %36 : vector<2x256xf32>
    %38 = arith.mulf %37, %37 : vector<2x256xf32>
    %c0_13 = arith.constant 0 : index
    %c1_14 = arith.constant 1 : index
    %39 = memref.load %arg1[%c0_13, %c1_14] : memref<4x4xf32, #tpu.memory_space<smem>>
    %40 = vector.extract_strided_slice %13 {offsets = [0, 0], sizes = [2, 256], strides = [1, 1]} : vector<2x1024xf32> to vector<2x256xf32>
    %41 = vector.broadcast %39 : f32 to vector<2x256xf32>
    %42 = arith.mulf %41, %40 : vector<2x256xf32>
    %c1_15 = arith.constant 1 : index
    %c1_16 = arith.constant 1 : index
    %43 = memref.load %arg1[%c1_15, %c1_16] : memref<4x4xf32, #tpu.memory_space<smem>>
    %44 = vector.extract_strided_slice %13 {offsets = [0, 256], sizes = [2, 256], strides = [1, 1]} : vector<2x1024xf32> to vector<2x256xf32>
    %45 = vector.broadcast %43 : f32 to vector<2x256xf32>
    %46 = arith.mulf %45, %44 : vector<2x256xf32>
    %47 = arith.addf %42, %46 : vector<2x256xf32>
    %c2_17 = arith.constant 2 : index
    %c1_18 = arith.constant 1 : index
    %48 = memref.load %arg1[%c2_17, %c1_18] : memref<4x4xf32, #tpu.memory_space<smem>>
    %49 = vector.extract_strided_slice %13 {offsets = [0, 512], sizes = [2, 256], strides = [1, 1]} : vector<2x1024xf32> to vector<2x256xf32>
    %50 = vector.broadcast %48 : f32 to vector<2x256xf32>
    %51 = arith.mulf %50, %49 : vector<2x256xf32>
    %52 = arith.addf %47, %51 : vector<2x256xf32>
    %c3_19 = arith.constant 3 : index
    %c1_20 = arith.constant 1 : index
    %53 = memref.load %arg1[%c3_19, %c1_20] : memref<4x4xf32, #tpu.memory_space<smem>>
    %54 = vector.extract_strided_slice %13 {offsets = [0, 768], sizes = [2, 256], strides = [1, 1]} : vector<2x1024xf32> to vector<2x256xf32>
    %55 = vector.broadcast %53 : f32 to vector<2x256xf32>
    %56 = arith.mulf %55, %54 : vector<2x256xf32>
    %57 = arith.addf %52, %56 : vector<2x256xf32>
    %58 = vector.extract_strided_slice %9 {offsets = [0, 1], sizes = [2, 1], strides = [1, 1]} : vector<2x4xf32> to vector<2x1xf32>
    %59 = vector.broadcast %58 : vector<2x1xf32> to vector<2x256xf32>
    %60 = arith.addf %57, %59 : vector<2x256xf32>
    %61 = vector.extract_strided_slice %10 {offsets = [0, 256], sizes = [2, 256], strides = [1, 1]} : vector<2x1024xf32> to vector<2x256xf32>
    %62 = arith.subf %60, %61 : vector<2x256xf32>
    %63 = arith.mulf %62, %62 : vector<2x256xf32>
    %64 = arith.addf %38, %63 : vector<2x256xf32>
    %c0_21 = arith.constant 0 : index
    %c2_22 = arith.constant 2 : index
    %65 = memref.load %arg1[%c0_21, %c2_22] : memref<4x4xf32, #tpu.memory_space<smem>>
    %66 = vector.extract_strided_slice %13 {offsets = [0, 0], sizes = [2, 256], strides = [1, 1]} : vector<2x1024xf32> to vector<2x256xf32>
    %67 = vector.broadcast %65 : f32 to vector<2x256xf32>
    %68 = arith.mulf %67, %66 : vector<2x256xf32>
    %c1_23 = arith.constant 1 : index
    %c2_24 = arith.constant 2 : index
    %69 = memref.load %arg1[%c1_23, %c2_24] : memref<4x4xf32, #tpu.memory_space<smem>>
    %70 = vector.extract_strided_slice %13 {offsets = [0, 256], sizes = [2, 256], strides = [1, 1]} : vector<2x1024xf32> to vector<2x256xf32>
    %71 = vector.broadcast %69 : f32 to vector<2x256xf32>
    %72 = arith.mulf %71, %70 : vector<2x256xf32>
    %73 = arith.addf %68, %72 : vector<2x256xf32>
    %c2_25 = arith.constant 2 : index
    %c2_26 = arith.constant 2 : index
    %74 = memref.load %arg1[%c2_25, %c2_26] : memref<4x4xf32, #tpu.memory_space<smem>>
    %75 = vector.extract_strided_slice %13 {offsets = [0, 512], sizes = [2, 256], strides = [1, 1]} : vector<2x1024xf32> to vector<2x256xf32>
    %76 = vector.broadcast %74 : f32 to vector<2x256xf32>
    %77 = arith.mulf %76, %75 : vector<2x256xf32>
    %78 = arith.addf %73, %77 : vector<2x256xf32>
    %c3_27 = arith.constant 3 : index
    %c2_28 = arith.constant 2 : index
    %79 = memref.load %arg1[%c3_27, %c2_28] : memref<4x4xf32, #tpu.memory_space<smem>>
    %80 = vector.extract_strided_slice %13 {offsets = [0, 768], sizes = [2, 256], strides = [1, 1]} : vector<2x1024xf32> to vector<2x256xf32>
    %81 = vector.broadcast %79 : f32 to vector<2x256xf32>
    %82 = arith.mulf %81, %80 : vector<2x256xf32>
    %83 = arith.addf %78, %82 : vector<2x256xf32>
    %84 = vector.extract_strided_slice %9 {offsets = [0, 2], sizes = [2, 1], strides = [1, 1]} : vector<2x4xf32> to vector<2x1xf32>
    %85 = vector.broadcast %84 : vector<2x1xf32> to vector<2x256xf32>
    %86 = arith.addf %83, %85 : vector<2x256xf32>
    %87 = vector.extract_strided_slice %10 {offsets = [0, 512], sizes = [2, 256], strides = [1, 1]} : vector<2x1024xf32> to vector<2x256xf32>
    %88 = arith.subf %86, %87 : vector<2x256xf32>
    %89 = arith.mulf %88, %88 : vector<2x256xf32>
    %90 = arith.addf %64, %89 : vector<2x256xf32>
    %c0_29 = arith.constant 0 : index
    %c3_30 = arith.constant 3 : index
    %91 = memref.load %arg1[%c0_29, %c3_30] : memref<4x4xf32, #tpu.memory_space<smem>>
    %92 = vector.extract_strided_slice %13 {offsets = [0, 0], sizes = [2, 256], strides = [1, 1]} : vector<2x1024xf32> to vector<2x256xf32>
    %93 = vector.broadcast %91 : f32 to vector<2x256xf32>
    %94 = arith.mulf %93, %92 : vector<2x256xf32>
    %c1_31 = arith.constant 1 : index
    %c3_32 = arith.constant 3 : index
    %95 = memref.load %arg1[%c1_31, %c3_32] : memref<4x4xf32, #tpu.memory_space<smem>>
    %96 = vector.extract_strided_slice %13 {offsets = [0, 256], sizes = [2, 256], strides = [1, 1]} : vector<2x1024xf32> to vector<2x256xf32>
    %97 = vector.broadcast %95 : f32 to vector<2x256xf32>
    %98 = arith.mulf %97, %96 : vector<2x256xf32>
    %99 = arith.addf %94, %98 : vector<2x256xf32>
    %c2_33 = arith.constant 2 : index
    %c3_34 = arith.constant 3 : index
    %100 = memref.load %arg1[%c2_33, %c3_34] : memref<4x4xf32, #tpu.memory_space<smem>>
    %101 = vector.extract_strided_slice %13 {offsets = [0, 512], sizes = [2, 256], strides = [1, 1]} : vector<2x1024xf32> to vector<2x256xf32>
    %102 = vector.broadcast %100 : f32 to vector<2x256xf32>
    %103 = arith.mulf %102, %101 : vector<2x256xf32>
    %104 = arith.addf %99, %103 : vector<2x256xf32>
    %c3_35 = arith.constant 3 : index
    %c3_36 = arith.constant 3 : index
    %105 = memref.load %arg1[%c3_35, %c3_36] : memref<4x4xf32, #tpu.memory_space<smem>>
    %106 = vector.extract_strided_slice %13 {offsets = [0, 768], sizes = [2, 256], strides = [1, 1]} : vector<2x1024xf32> to vector<2x256xf32>
    %107 = vector.broadcast %105 : f32 to vector<2x256xf32>
    %108 = arith.mulf %107, %106 : vector<2x256xf32>
    %109 = arith.addf %104, %108 : vector<2x256xf32>
    %110 = vector.extract_strided_slice %9 {offsets = [0, 3], sizes = [2, 1], strides = [1, 1]} : vector<2x4xf32> to vector<2x1xf32>
    %111 = vector.broadcast %110 : vector<2x1xf32> to vector<2x256xf32>
    %112 = arith.addf %109, %111 : vector<2x256xf32>
    %113 = vector.extract_strided_slice %10 {offsets = [0, 768], sizes = [2, 256], strides = [1, 1]} : vector<2x1024xf32> to vector<2x256xf32>
    %114 = arith.subf %112, %113 : vector<2x256xf32>
    %115 = arith.mulf %114, %114 : vector<2x256xf32>
    %116 = arith.addf %90, %115 : vector<2x256xf32>
    %117 = vector.extract_strided_slice %116 {offsets = [0, 0], sizes = [2, 128], strides = [1, 1]} : vector<2x256xf32> to vector<2x128xf32>
    %118 = vector.extract_strided_slice %116 {offsets = [0, 128], sizes = [2, 128], strides = [1, 1]} : vector<2x256xf32> to vector<2x128xf32>
    %119 = arith.addf %117, %118 : vector<2x128xf32>
    %c0_37 = arith.constant 0 : index
    %c0_38 = arith.constant 0 : index
    %120 = vector.load %arg6[%c0_37, %c0_38] : memref<2x128xf32, #tpu.memory_space<vmem>>, vector<2x128xf32>
    tpu.vector_store %arg6[%c0_37, %c0_38], %119 {strides = array<i32>} : memref<2x128xf32, #tpu.memory_space<vmem>>, vector<2x128xf32>,
    return
  }
  func.func @transform_0(%arg0: i32) -> (i32, i32) {
    %c0_i32 = arith.constant 0 : i32
    %c0_i32_0 = arith.constant 0 : i32
    %c0_i32_1 = arith.constant 0 : i32
    return %c0_i32, %c0_i32_0 : i32, i32
  }
  func.func @transform_1(%arg0: i32) -> (i32, i32) {
    %c0_i32 = arith.constant 0 : i32
    %c0_i32_0 = arith.constant 0 : i32
    return %arg0, %c0_i32 : i32, i32
  }
  func.func @transform_2(%arg0: i32) -> (i32, i32) {
    %c0_i32 = arith.constant 0 : i32
    %c0_i32_0 = arith.constant 0 : i32
    return %arg0, %c0_i32 : i32, i32
  }
  func.func @transform_3(%arg0: i32) -> (i32, i32) {
    %c0_i32 = arith.constant 0 : i32
    %c0_i32_0 = arith.constant 0 : i32
    return %arg0, %c0_i32 : i32, i32
  }
  func.func @transform_4(%arg0: i32) -> (i32, i32) {
    %c0_i32 = arith.constant 0 : i32
    %c0_i32_0 = arith.constant 0 : i32
    return %arg0, %c0_i32 : i32, i32
  }
  func.func @transform_5(%arg0: i32) -> (i32, i32) {
    %c0_i32 = arith.constant 0 : i32
    %c0_i32_0 = arith.constant 0 : i32
    return %arg0, %c0_i32 : i32, i32
  }
}

</mosaic_0001>

<bundles_post_ra>
// kernel: tpu_custom_call.1
= control target key start
LH: loop header
LB: loop body
LE: loop exit
PB: predicated region body
PF: predicated region fallthrough
CT: control target
= control target key end

     0   :  { %10 = vsyncpa [#allocation5], 0  ;;  %s569_s0 = inlined_call_operand.hbm [shape: f32[4,4], index: 0, kind: input, shape index: {}]   ;;  %s570_s1 = inlined_call_operand.vmem [shape: f32[2,1], index: 1, kind: input, shape index: {}]   ;;  %s571_s2 = inlined_call_operand.hbm [shape: f32[2,4], index: 2, kind: input, shape index: {}]   ;;  %s572_s3 = inlined_call_operand.vmem [shape: bf16[2,1024], index: 3, kind: input, shape index: {}]   ;;  %s573_s4 = inlined_call_operand.hbm [shape: bf16[2,1024], index: 4, kind: input, shape index: {}]   ;;  %s574_s5 = inlined_call_operand.hbm [shape: f32[2,128], index: 5, kind: output, shape index: {}]  }
   0x1   :  { %11 = vsyncpa [#allocation3], 0 }
   0x2   :  { %12 = vsyncpa [#allocation8], 0 }
   0x3   :  { %13 = vsyncpa [#allocation4], 0  ;;  %s428_s18 = smov [#allocation2]   ;;  %s429_s21 = smov [#allocation6]  }
   0x4   :  { %21 = dma.hbm_to_smem %s569_s0, 64, %s428_s18, [#allocation5]  }
   0x5   :  { %s30_s22 = sshll.u32 %s429_s21, 4  ;;  %s430_s23 = smov [#allocation7]   ;;  %s31_s22 = int_to_ptr.vmem [resolvable:$true] %s30_s22 }
   0x6   :  { %s42_s24 = sshll.u32 %s430_s23, 4  ;;  %s368_s25 = scalar_lea.vmem %s31_s22, 32  ;;  %s43_s24 = int_to_ptr.vmem [resolvable:$true] %s42_s24 }
   0x7   :  { %p369_p0 = scmp.ne.s32.totalorder %s31_s22, %s368_s25  ;;  %p373_p1 = scmp.lt.s32.totalorder %s31_s22, %s31_s22 }
   0x8   :  { %p374_p2 = scmp.lt.s32.totalorder %s368_s25, %s368_s25 }
   0xa   :  { %p375_p3 = por %p374_p2, %p373_p1 }
   0xc   :  { %p376_p4 = pnand %p375_p3, %p369_p0 }
   0xe   :  { %379 = shalt.err (!%p376_p4)
}
   0xf   :  { %33 = dma.hbm_to_vmem [thread:$0]  %s571_s2, 32, %s31_s22, [#allocation3]  }
  0x10   :  { %s388_s28 = scalar_lea.vmem %s43_s24, 128  ;;  %p393_p6 = scmp.lt.s32.totalorder %s43_s24, %s43_s24 }
  0x11   :  { %p389_p5 = scmp.ne.s32.totalorder %s43_s24, %s388_s28  ;;  %p394_p7 = scmp.lt.s32.totalorder %s388_s28, %s388_s28 }
  0x13   :  { %p395_p8 = por %p394_p7, %p393_p6 }
  0x15   :  { %p396_p9 = pnand %p395_p8, %p389_p5 }
  0x17   :  { %399 = shalt.err (!%p396_p9)
}
  0x18   :  { %45 = dma.hbm_to_vmem [thread:$0]  %s573_s4, 128, %s43_s24, [#allocation8]  }
  0x19   :  { %420 = dma.done.wait [#allocation5], 64  }
  0x1a   :  { %421 = vsyncadd [#allocation5], 4294967232 }
  0x1b   :  { %422 = dma.done.wait [#allocation3], 32  }
  0x1c   :  { %423 = vsyncadd [#allocation3], 4294967264 }
  0x1d   :  { %424 = dma.done.wait [#allocation8], 128  }
  0x1e   :  { %425 = vsyncadd [#allocation8], 4294967168 }
  0x1f   :  { %55 = sfence }
  0x20   :  { %v56_v0 = vld [vmem:[%s570_s1] sm:$0x3]  ;;  %v431_v1 = vmov 0   ;;  %v432_v4 = vmov 1   ;;  %v433_v6 = vmov 2   ;;  %v434_v7 = vmov 3  }
  0x21   :  { %348 = vset.pattern.permute.xlu0 %v431_v1  ;;  %v57_v2 = vmax.f32 %v56_v0, 0.001  ;;  %v65_v3 = vld [vmem:[#allocation6] sm:$0x3]  ;;  %349 = vset.pattern.permute.xlu1 %v432_v4  ;;  %v483_v9 = vld [vmem:[#allocation7] sm:$0xff]  ;;  %v79_v14 = vlaneseq  ;;  %s495_s1 = sld [smem:[#allocation2]] }
  0x22   :  { %223 = vperm.xlu1 %349, %v65_v3   ;;  %v59_v8 = vld [vmem:[%s572_s3] sm:$0xff]  ;;  %v63_v11 = vunpack.c.l.bf16 %v483_v9  ;;  %v435_v12 = vmov 1983009808   ;;  %v64_v16 = vunpack.c.h.bf16 %v483_v9  ;;  %s499_s3 = sld [smem:[#allocation2 + $0x100]]  ;;  %v436_v28 = vmov 269488144  }
  0x23   :  { %v58_v5 = vmin.f32 %v57_v2, 0.999  ;;  %v60_v10 = vunpack.c.l.bf16 %v59_v8  ;;  %v77_v13 = vunpack.c.l.s4 %v435_v12  ;;  %v61_v15 = vunpack.c.h.bf16 %v59_v8  ;;  %s503_s7 = sld [smem:[#allocation2 + $0x80]]  ;;  %s437_s21 = smov [#allocation9]  }
  0x24   :  { %v80_v19 = vshrl.u32 %v79_v14, 7  ;;  %s505_s8 = sld [smem:[#allocation2 + $0x180]]  ;;  %v197_v29 = vunpack.c.l.s4 %v436_v28  ;;  %s312_s22 = sshll.u32 %s437_s21, 4  ;;  %s313_s22 = int_to_ptr.vmem [resolvable:$true] %s312_s22 }
  0x25   :  { %70 = vperm.xlu0 %348, %v58_v5   ;;  %v489_v17 = vsub.f32 %v60_v10, %v63_v11  ;;  %v78_v18 = vunpack.c.0.s8 %v77_v13  ;;  %v493_v20 = vsub.f32 %v61_v15, %v64_v16  ;;  %s507_s9 = sld [smem:[#allocation2 + $0x1]]  ;;  %s400_s23 = scalar_lea.vmem %s313_s22, 32 }
  0x26   :  { %350 = vset.pattern.permute.xlu1 %v433_v6  ;;  %s510_s10 = sld [smem:[#allocation2 + $0x81]]  ;;  %v198_v35 = vunpack.c.0.s8 %v197_v29  ;;  %p401_p10 = scmp.ne.s32.totalorder %s313_s22, %s400_s23 }
  0x27   :  { %255 = vperm.xlu1 %350, %v65_v3   ;;  %v75_v21 = vcombine.high %v489_v17, %v489_v17  ;;  %v81_v22 = vsub.s32 %v78_v18, %v80_v19  ;;  %v92_v23 = vcombine.high %v493_v20, %v493_v20  ;;  %s513_s11 = sld [smem:[#allocation2 + $0x101]]  ;;  %v172_v54 = vstv %s495_s1  ;;  %p405_p11 = scmp.lt.s32.totalorder %s313_s22, %s313_s22 }
  0x28   :  { %s515_s12 = sld [smem:[#allocation2 + $0x181]]  ;;  %v535_v51 = vsub.s32 %v198_v35, %v80_v19  ;;  %v182_v57 = vstv %s499_s3  ;;  %v234_v6 = vrot.slane %v489_v17, 4  ;;  %p406_p12 = scmp.lt.s32.totalorder %s400_s23, %s400_s23 }
  0x29   :  { %194 = vperm.xlu0 %348, %v65_v3   ;;  %v82_v24 = vrot.slane %v489_v17, %v81_v22  ;;  %v89_v25 = vrot.slane %v75_v21, %v81_v22  ;;  %v99_v26 = vrot.slane %v493_v20, %v81_v22  ;;  %v106_v27 = vrot.slane %v92_v23, %v81_v22  ;;  %s517_s13 = sld [smem:[#allocation2 + $0x2]] }
  0x2a   :  { %s519_s14 = sld [smem:[#allocation2 + $0x82]]  ;;  %v175_v55 = vstv %s503_s7  ;;  %v186_v58 = vstv %s505_s8  ;;  %p407_p13 = por %p406_p12, %p405_p11 }
  0x2b   :  { %v90_v30 = vcombine.high %v82_v24, %v82_v24  ;;  %v91_v31 = vcombine.high %v89_v25, %v89_v25  ;;  %v107_v32 = vcombine.high %v99_v26, %v99_v26  ;;  %v108_v33 = vcombine.high %v106_v27, %v106_v27  ;;  %s521_s15 = sld [smem:[#allocation2 + $0x102]] }
  0x2c   :  { %s523_s16 = sld [smem:[#allocation2 + $0x182]]  ;;  %v208_v59 = vstv %s507_s9  ;;  %v211_v61 = vstv %s510_s10  ;;  %p408_p0 = pnand %p407_p13, %p401_p10 }
  0x2d   :  { %351 = vset.pattern.permute.xlu0 %v434_v7  ;;  %s525_s17 = sld [smem:[#allocation2 + $0x3]]  ;;  %v215_v62 = vstv %s513_s11 }
  0x2e   :  { %285 = vperm.xlu0 %351, %v65_v3   ;;  %s527_s18 = sld [smem:[#allocation2 + $0x83]]  ;;  %v219_v63 = vstv %s515_s12 }
  0x2f   :  { %s529_s19 = sld [smem:[#allocation2 + $0x103]]  ;;  %v240_v1 = vstv %s517_s13 }
  0x30   :  { %s533_s20 = sld [smem:[#allocation2 + $0x183]]  ;;  %v243_v2 = vstv %s519_s14 }
  0x31   :  { %v247_v3 = vstv %s521_s15 }
  0x32   :  { %v251_v7 = vstv %s523_s16 }
  0x33   :  { %v270_v8 = vstv %s525_s17 }
  0x34   :  { %v273_v13 = vstv %s527_s18 }
  0x35   :  { %v277_v14 = vstv %s529_s19 }
  0x36   :  { %v281_v15 = vstv %s533_s20 }
  0x9d   :  { %v531_v46 = vpop.permute.xlu1 %223 }
  0xa0   :  { %v71_v34 = vpop.permute.xlu0 %70 }
  0xa1   :  { %v117_v36 = vmul.f32 %v82_v24, %v71_v34  ;;  %v118_v37 = vmul.f32 %v90_v30, %v71_v34  ;;  %v119_v38 = vmul.f32 %v89_v25, %v71_v34  ;;  %v120_v39 = vmul.f32 %v91_v31, %v71_v34 }
  0xa2   :  { %v121_v40 = vmul.f32 %v99_v26, %v71_v34  ;;  %v122_v41 = vmul.f32 %v107_v32, %v71_v34  ;;  %v123_v42 = vmul.f32 %v106_v27, %v71_v34  ;;  %v124_v43 = vmul.f32 %v108_v33, %v71_v34  ;;  %v256_v4 = vpop.permute.xlu1 %255 }
  0xa3   :  { %v133_v44 = vcombine.low %v117_v36, %v118_v37  ;;  %v134_v45 = vcombine.low %v119_v38, %v120_v39 }
  0xa4   :  { %v150_v47 = vcombine.low %v121_v40, %v122_v41  ;;  %v151_v48 = vcombine.low %v123_v42, %v124_v43  ;;  %v195_v12 = vpop.permute.xlu0 %194  ;;  %v231_v41 = vrot.slane %v531_v46, %v535_v51 }
  0xa5   :  { %v141_v49 = vrot.slane %v133_v44, %v81_v22  ;;  %v148_v50 = vrot.slane %v134_v45, %v81_v22 }
  0xa6   :  { %v158_v52 = vrot.slane %v150_v47, %v81_v22  ;;  %v165_v53 = vrot.slane %v151_v48, %v81_v22  ;;  %v202_v47 = vrot.slane %v195_v12, %v535_v51 }
  0xa7   :  { %v149_v56 = vcombine.low %v141_v49, %v148_v50 }
  0xa8   :  { %v166_v60 = vcombine.low %v158_v52, %v165_v53 }
  0xa9   :  { %v169_v0 = vadd.f32 %v149_v56, %v63_v11  ;;  %v263_v11 = vrot.slane %v256_v4, %v535_v51  ;;  %v286_v32 = vpop.permute.xlu0 %285 }
  0xaa   :  { %v170_v5 = vadd.f32 %v166_v60, %v64_v16  ;;  %v293_v44 = vrot.slane %v286_v32, %v535_v51 }
  0xab   :  { %v177_v10 = vrot.slane %v169_v0, 4  ;;  %v173_v18 = vmul.f32 %v172_v54, %v169_v0  ;;  %v209_v21 = vmul.f32 %v208_v59, %v169_v0  ;;  %v241_v24 = vmul.f32 %v240_v1, %v169_v0 }
  0xac   :  { %v188_v19 = vrot.slane %v170_v5, 4  ;;  %v183_v9 = vmul.f32 %v182_v57, %v170_v5  ;;  %v216_v16 = vmul.f32 %v215_v62, %v170_v5  ;;  %v271_v26 = vmul.f32 %v270_v8, %v169_v0 }
  0xad   :  { %v179_v22 = vmul.f32 %v177_v10, %v175_v55  ;;  %v212_v23 = vmul.f32 %v211_v61, %v177_v10  ;;  %v244_v25 = vmul.f32 %v243_v2, %v177_v10  ;;  %v274_v27 = vmul.f32 %v273_v13, %v177_v10 }
  0xae   :  { %v248_v31 = vmul.f32 %v247_v3, %v170_v5  ;;  %v190_v33 = vmul.f32 %v188_v19, %v186_v58  ;;  %v220_v34 = vmul.f32 %v219_v63, %v188_v19  ;;  %v278_v36 = vmul.f32 %v277_v14, %v170_v5 }
  0xaf   :  { %v180_v28 = vadd.f32 %v179_v22, %v173_v18  ;;  %v213_v29 = vadd.f32 %v212_v23, %v209_v21  ;;  %v245_v30 = vadd.f32 %v244_v25, %v241_v24  ;;  %v275_v35 = vadd.f32 %v274_v27, %v271_v26 }
  0xb0   :  { %v252_v40 = vmul.f32 %v251_v7, %v188_v19  ;;  %v282_v43 = vmul.f32 %v281_v15, %v188_v19  ;;  %v296_v55 = vrot.slane %v493_v20, 4 }
  0xb1   :  { %v184_v37 = vadd.f32 %v183_v9, %v180_v28  ;;  %v217_v38 = vadd.f32 %v216_v16, %v213_v29  ;;  %v249_v39 = vadd.f32 %v248_v31, %v245_v30  ;;  %v279_v42 = vadd.f32 %v278_v36, %v275_v35 }
  0xb3   :  { %v191_v45 = vadd.f32 %v190_v33, %v184_v37  ;;  %v221_v48 = vadd.f32 %v220_v34, %v217_v38  ;;  %v253_v49 = vadd.f32 %v252_v40, %v249_v39  ;;  %v283_v50 = vadd.f32 %v282_v43, %v279_v42 }
  0xb5   :  { %v204_v52 = vadd.f32 %v202_v47, %v191_v45  ;;  %v233_v53 = vadd.f32 %v231_v41, %v221_v48  ;;  %v265_v54 = vadd.f32 %v263_v11, %v253_v49  ;;  %v295_v56 = vadd.f32 %v293_v44, %v283_v50 }
  0xb7   :  { %v205_v57 = vsub.f32 %v204_v52, %v489_v17  ;;  %v236_v58 = vsub.f32 %v233_v53, %v234_v6  ;;  %v266_v46 = vsub.f32 %v265_v54, %v493_v20  ;;  %v298_v61 = vsub.f32 %v295_v56, %v296_v55 }
  0xb9   :  { %v206_v59 = vmul.f32 %v205_v57, %v205_v57  ;;  %v237_v60 = vmul.f32 %v236_v58, %v236_v58  ;;  %v267_v62 = vmul.f32 %v266_v46, %v266_v46  ;;  %v299_v0 = vmul.f32 %v298_v61, %v298_v61 }
  0xbb   :  { %v238_v63 = vadd.f32 %v237_v60, %v206_v59 }
  0xbd   :  { %v268_v51 = vadd.f32 %v267_v62, %v238_v63 }
  0xbf   :  { %v300_v1 = vadd.f32 %v299_v0, %v268_v51 }
  0xc1   :  { %v302_v2 = vrot.slane %v300_v1, 2 }
  0xc3   :  { %v304_v3 = vadd.f32 %v302_v2, %v300_v1 }
  0xc5   :  { %305 = vst [vmem:[#allocation9] sm:$0x3] %v304_v3 }
  0xc6   :  { %411 = shalt.err (!%p408_p0)
}
  0xc7   :  { %315 = dma.vmem_to_hbm [thread:$0]  %s313_s22, 32, %s574_s5, [#allocation4]  }
  0xc8   :  { %426 = dma.done.wait [#allocation4], 32  }
  0xc9   :  { %427 = vsyncadd [#allocation4], 4294967264 }
  0xca   :  { %319 = vsyncpa [#allocation3], 1 }
  0xcb   :  { %320 = vsyncpa [#allocation8], 1 }
  0xcc   :  { %321 = vsyncpa [#allocation4], 1 }
  0xcd   :  { %322 = vsyncpa [#allocation5], 1 }

</bundles_post_ra>
